<compile_context>
chip_gen: v7x
topology: tpu7x:2x2x1
jax: 0.10.0
libtpu: 0.0.40
codegen_flags: <defaults>
</compile_context>

<pallas_src>
import functools

import jax
import jax.numpy as jnp
from jax import lax
from jax.experimental import pallas as pl
from jax.experimental.pallas import tpu as pltpu

LANE = 128
SUBLANE = 8


def _round_up(n, m):
    return ((n + m - 1) // m) * m


def _gelu(x):
    # tanh-approx GELU (EUP tanh path). TODO(synk): PyTorch nn.GELU default is erf.
    c = jnp.float32(0.7978845608028654)  # sqrt(2/pi)
    return 0.5 * x * (1.0 + jnp.tanh(c * (x + 0.044715 * x * x * x)))


def inference_kernel(x_ref, w_tail_ref, b_tail_ref,
                     wqkv_ref, wo_ref,
                     w1_ref, b1_ref, w2_ref, b2_ref,
                     w_head_ref, b_head_ref, out_ref,
                     *, hidden_p, seq_len, seq_pad):
    f32 = jnp.float32
    bf16 = jnp.bfloat16

    # --- x[torch.isnan(x)] = 0 (elementwise, f32) ---
    x = x_ref[...]
    x = jnp.where(jnp.isnan(x), jnp.zeros_like(x), x)

    # --- tail in-projection: (S_p, Din_p) @ (Din_p, H_p), bf16 fed / f32 acc ---
    h = jnp.dot(x.astype(bf16), w_tail_ref[...],
                preferred_element_type=f32) + b_tail_ref[...]

    # --- fused QKV projection (one matmul); 1/sqrt(d) already folded into Wq ---
    qkv = jnp.dot(h.astype(bf16), wqkv_ref[...], preferred_element_type=f32)
    q = qkv[:, 0 * hidden_p:1 * hidden_p]
    k = qkv[:, 1 * hidden_p:2 * hidden_p]
    v = qkv[:, 2 * hidden_p:3 * hidden_p]

    # --- attention scores: contract last dims directly (no k transpose) ---
    s = lax.dot_general(q.astype(bf16), k.astype(bf16),
                        (((1,), (1,)), ((), ())),
                        preferred_element_type=f32)
    if seq_pad != seq_len:
        # mask out padded key rows (only present when S was padded)
        key_ids = lax.broadcasted_iota(jnp.int32, s.shape, 1)
        s = jnp.where(key_ids < seq_len, s, -jnp.inf)

    # --- softmax (f32); reciprocal on the EUP instead of a VALU divide ---
    s = s - jnp.max(s, axis=-1, keepdims=True)
    p = jnp.exp(s)
    denom = jnp.sum(p, axis=-1, keepdims=True)
    p = p * pl.reciprocal(denom, approx=True)

    a = jnp.dot(p.astype(bf16), v.astype(bf16), preferred_element_type=f32)
    h = h + jnp.dot(a.astype(bf16), wo_ref[...], preferred_element_type=f32)

    # --- MLP block (residual) ---
    m = jnp.dot(h.astype(bf16), w1_ref[...], preferred_element_type=f32) + b1_ref[...]
    m = _gelu(m)
    h = h + jnp.dot(m.astype(bf16), w2_ref[...], preferred_element_type=f32) + b2_ref[...]

    # --- output head (lane-dense padded output: D_out_p multiple of 128) ---
    out = jnp.dot(h.astype(bf16), w_head_ref[...], preferred_element_type=f32)
    out_ref[...] = (out + b_head_ref[...]).astype(out_ref.dtype)


def inference_forward(x, params):
    """x: (S, J, C) float32, possibly containing NaN. Returns (1, S, D_out)."""
    S, J, C = x.shape
    d_in = J * C

    (w_tail, b_tail, wq, wk, wv, wo,
     w1, b1, w2, b2, w_head, b_head) = params
    hidden = w_tail.shape[1]
    mlp_hidden = w1.shape[1]
    d_out = w_head.shape[1]

    # --- lane/sublane padding of every feature dim (done once on host side) ---
    d_in_p = _round_up(d_in, LANE)
    hidden_p = _round_up(hidden, LANE)
    mlp_p = _round_up(mlp_hidden, LANE)
    d_out_p = _round_up(d_out, LANE)
    s_p = _round_up(S, SUBLANE)

    def pad2(a, rows, cols):
        return jnp.pad(a, ((0, rows - a.shape[0]), (0, cols - a.shape[1])))

    def pad_cols(a, cols):
        return jnp.pad(a, ((0, 0), (0, cols - a.shape[1])))

    bf = lambda a: a.astype(jnp.bfloat16)

    # glue: the torch reshape, then zero-pad to lane-dense shapes
    x2 = x.reshape(S, d_in)
    x2p = pad2(x2, s_p, d_in_p)

    # fold 1/sqrt(d_head) (single head -> hidden) into Wq, fuse QKV, then pad
    scale = 1.0 / jnp.sqrt(jnp.float32(hidden))
    wqkv = jnp.concatenate([pad_cols(wq * scale, hidden_p),
                            pad_cols(wk, hidden_p),
                            pad_cols(wv, hidden_p)], axis=1)   # (hidden, 3*H_p)
    wqkv = jnp.pad(wqkv, ((0, hidden_p - hidden), (0, 0)))     # (H_p, 3*H_p)

    w_tail_p = bf(pad2(w_tail, d_in_p, hidden_p))
    b_tail_p = pad_cols(b_tail, hidden_p)
    wqkv_p = bf(wqkv)
    wo_p = bf(pad2(wo, hidden_p, hidden_p))
    w1_p = bf(pad2(w1, hidden_p, mlp_p))
    b1_p = pad_cols(b1, mlp_p)
    w2_p = bf(pad2(w2, mlp_p, hidden_p))
    b2_p = pad_cols(b2, hidden_p)
    w_head_p = bf(pad2(w_head, hidden_p, d_out_p))
    b_head_p = pad_cols(b_head, d_out_p)

    def full_spec(shape):
        return pl.BlockSpec(shape, lambda i, _ndim=len(shape): (0,) * _ndim)

    args = (x2p, w_tail_p, b_tail_p, wqkv_p, wo_p,
            w1_p, b1_p, w2_p, b2_p, w_head_p, b_head_p)
    in_specs = [full_spec(a.shape) for a in args]

    kernel = functools.partial(inference_kernel,
                               hidden_p=hidden_p, seq_len=S, seq_pad=s_p)

    out_p = pl.pallas_call(
        kernel,
        out_shape=jax.ShapeDtypeStruct((s_p, d_out_p), jnp.float32),
        grid=(1,),
        in_specs=in_specs,
        out_specs=full_spec((s_p, d_out_p)),
        compiler_params=pltpu.CompilerParams(
            dimension_semantics=("arbitrary",)),
    )(*args)

    # glue: drop the lane/sublane padding and restore the leading batch dim of 1
    return out_p[:S, :d_out].reshape(1, S, d_out)


def make_params(key, d_in, hidden, mlp_hidden, d_out):
    ks = jax.random.split(key, 12)
    init = lambda k, shape, scale: (scale * jax.random.normal(k, shape)).astype(jnp.float32)
    w_tail = init(ks[0], (d_in, hidden), 0.1)
    b_tail = jnp.zeros((1, hidden), jnp.float32)
    wq = init(ks[1], (hidden, hidden), 0.1)
    wk = init(ks[2], (hidden, hidden), 0.1)
    wv = init(ks[3], (hidden, hidden), 0.1)
    wo = init(ks[4], (hidden, hidden), 0.1)
    w1 = init(ks[5], (hidden, mlp_hidden), 0.1)
    b1 = jnp.zeros((1, mlp_hidden), jnp.float32)
    w2 = init(ks[6], (mlp_hidden, hidden), 0.1)
    b2 = jnp.zeros((1, hidden), jnp.float32)
    w_head = init(ks[7], (hidden, d_out), 0.1)
    b_head = jnp.zeros((1, d_out), jnp.float32)
    return (w_tail, b_tail, wq, wk, wv, wo, w1, b1, w2, b2, w_head, b_head)


if __name__ == "__main__":
    # Shapes implied by the module: x is (seq, n_relevant_ids, n_coords),
    # tail in_features = n_coords * len(relevant_ids).
    S, J, C = 8, 4, 4           # seq=8, 4 relevant joints, 4 coords -> D_in=16
    D_IN = J * C
    HIDDEN = 32
    MLP_HIDDEN = 64
    D_OUT = D_IN                # model predicts coords back out

    key = jax.random.PRNGKey(0)
    kx, kp = jax.random.split(key)
    x = jax.random.normal(kx, (S, J, C), dtype=jnp.float32)
    # Inject NaNs to exercise the `x[isnan(x)] = 0` path.
    x = x.at[0, 1, 2].set(jnp.nan)
    x = x.at[3, 0, 0].set(jnp.nan)

    params = make_params(kp, D_IN, HIDDEN, MLP_HIDDEN, D_OUT)

    out = inference_forward(x, params)
    out = jax.block_until_ready(out)

    assert out.shape == (1, S, D_OUT), out.shape
    assert bool(jnp.all(jnp.isfinite(out))), "output contains non-finite values"
    print("KERNEL_OK")
</pallas_src>

<mosaic_0001>
module attributes {stable_mosaic.version = 11 : i64} {
  func.func @inference_kernel(%arg0: i32, %arg1: memref<8x128xf32, #tpu.memory_space<vmem>>, %arg2: memref<128x128xbf16, #tpu.memory_space<vmem>>, %arg3: memref<1x128xf32, #tpu.memory_space<vmem>>, %arg4: memref<128x384xbf16, #tpu.memory_space<vmem>>, %arg5: memref<128x128xbf16, #tpu.memory_space<vmem>>, %arg6: memref<128x128xbf16, #tpu.memory_space<vmem>>, %arg7: memref<1x128xf32, #tpu.memory_space<vmem>>, %arg8: memref<128x128xbf16, #tpu.memory_space<vmem>>, %arg9: memref<1x128xf32, #tpu.memory_space<vmem>>, %arg10: memref<128x128xbf16, #tpu.memory_space<vmem>>, %arg11: memref<1x128xf32, #tpu.memory_space<vmem>>, %arg12: memref<8x128xf32, #tpu.memory_space<vmem>>) attributes {dimension_semantics = [#tpu.dimension_semantics<arbitrary>], iteration_bounds = array<i64: 1>, scalar_prefetch = 0 : i64, scratch_operands = 0 : i64, tpu.core_type = #tpu.core_type<tc>, window_params = [{pipeline_mode = #tpu.pipeline_mode<synchronous>, transform_indices = @transform_0, window_bounds = array<i64: 8, 128>}, {pipeline_mode = #tpu.pipeline_mode<synchronous>, transform_indices = @transform_1, window_bounds = array<i64: 128, 128>}, {pipeline_mode = #tpu.pipeline_mode<synchronous>, transform_indices = @transform_2, window_bounds = array<i64: 1, 128>}, {pipeline_mode = #tpu.pipeline_mode<synchronous>, transform_indices = @transform_3, window_bounds = array<i64: 128, 384>}, {pipeline_mode = #tpu.pipeline_mode<synchronous>, transform_indices = @transform_4, window_bounds = array<i64: 128, 128>}, {pipeline_mode = #tpu.pipeline_mode<synchronous>, transform_indices = @transform_5, window_bounds = array<i64: 128, 128>}, {pipeline_mode = #tpu.pipeline_mode<synchronous>, transform_indices = @transform_6, window_bounds = array<i64: 1, 128>}, {pipeline_mode = #tpu.pipeline_mode<synchronous>, transform_indices = @transform_7, window_bounds = array<i64: 128, 128>}, {pipeline_mode = #tpu.pipeline_mode<synchronous>, transform_indices = @transform_8, window_bounds = array<i64: 1, 128>}, {pipeline_mode = #tpu.pipeline_mode<synchronous>, transform_indices = @transform_9, window_bounds = array<i64: 128, 128>}, {pipeline_mode = #tpu.pipeline_mode<synchronous>, transform_indices = @transform_10, window_bounds = array<i64: 1, 128>}, {pipeline_mode = #tpu.pipeline_mode<synchronous>, transform_indices = @transform_11, window_bounds = array<i64: 8, 128>}]} {
    %c0 = arith.constant 0 : index
    %c0_0 = arith.constant 0 : index
    %0 = vector.load %arg1[%c0, %c0_0] : memref<8x128xf32, #tpu.memory_space<vmem>>, vector<8x128xf32>
    %1 = arith.cmpf one, %0, %0 : vector<8x128xf32>
    %cst = arith.constant 0.000000e+00 : f32
    %2 = vector.broadcast %cst : f32 to vector<8x128xf32>
    %3 = arith.select %1, %2, %0 : vector<8x128xi1>, vector<8x128xf32>
    %4 = arith.truncf %3 : vector<8x128xf32> to vector<8x128xbf16>
    %c0_1 = arith.constant 0 : index
    %c0_2 = arith.constant 0 : index
    %5 = vector.load %arg2[%c0_1, %c0_2] : memref<128x128xbf16, #tpu.memory_space<vmem>>, vector<128x128xbf16>
    %cst_3 = arith.constant dense<0.000000e+00> : vector<8x128xf32>
    %6 = tpu.matmul %4, %5, %cst_3 {dimension_numbers = #tpu.dot_dimension_numbers<[1], [0], [0], [1], [0, 0, 1, 1], [], []>} : vector<8x128xbf16>, vector<128x128xbf16>, vector<8x128xf32> -> vector<8x128xf32>
    %c0_4 = arith.constant 0 : index
    %c0_5 = arith.constant 0 : index
    %7 = vector.load %arg3[%c0_4, %c0_5] : memref<1x128xf32, #tpu.memory_space<vmem>>, vector<1x128xf32>
    %8 = vector.broadcast %7 : vector<1x128xf32> to vector<8x128xf32>
    %9 = arith.addf %6, %8 : vector<8x128xf32>
    %10 = arith.truncf %9 : vector<8x128xf32> to vector<8x128xbf16>
    %c0_6 = arith.constant 0 : index
    %c0_7 = arith.constant 0 : index
    %11 = vector.load %arg4[%c0_6, %c0_7] : memref<128x384xbf16, #tpu.memory_space<vmem>>, vector<128x384xbf16>
    %cst_8 = arith.constant dense<0.000000e+00> : vector<8x384xf32>
    %12 = tpu.matmul %10, %11, %cst_8 {dimension_numbers = #tpu.dot_dimension_numbers<[1], [0], [0], [1], [0, 0, 1, 1], [], []>} : vector<8x128xbf16>, vector<128x384xbf16>, vector<8x384xf32> -> vector<8x384xf32>
    %13 = vector.extract_strided_slice %12 {offsets = [0, 0], sizes = [8, 128], strides = [1, 1]} : vector<8x384xf32> to vector<8x128xf32>
    %14 = vector.extract_strided_slice %12 {offsets = [0, 128], sizes = [8, 128], strides = [1, 1]} : vector<8x384xf32> to vector<8x128xf32>
    %15 = vector.extract_strided_slice %12 {offsets = [0, 256], sizes = [8, 128], strides = [1, 1]} : vector<8x384xf32> to vector<8x128xf32>
    %16 = arith.truncf %13 : vector<8x128xf32> to vector<8x128xbf16>
    %17 = arith.truncf %14 : vector<8x128xf32> to vector<8x128xbf16>
    %cst_9 = arith.constant dense<0.000000e+00> : vector<8x8xf32>
    %18 = tpu.matmul %16, %17, %cst_9 {dimension_numbers = #tpu.dot_dimension_numbers<[1], [1], [0], [0], [0, 0, 1, 0], [], []>} : vector<8x128xbf16>, vector<8x128xbf16>, vector<8x8xf32> -> vector<8x8xf32>
    %cst_10 = arith.constant dense<0xFF800000> : vector<8xf32>
    %19 = vector.multi_reduction <maximumf>, %18, %cst_10 [1] : vector<8x8xf32> to vector<8xf32>
    %20 = vector.shape_cast %19 : vector<8xf32> to vector<8x1xf32>
    %21 = vector.broadcast %20 : vector<8x1xf32> to vector<8x8xf32>
    %22 = arith.subf %18, %21 : vector<8x8xf32>
    %23 = math.exp %22 : vector<8x8xf32>
    %cst_11 = arith.constant dense<0.000000e+00> : vector<8xf32>
    %24 = vector.multi_reduction <add>, %23, %cst_11 [1] : vector<8x8xf32> to vector<8xf32>
    %25 = vector.shape_cast %24 : vector<8xf32> to vector<8x1xf32>
    %26 = tpu.reciprocal %25 {approx = true} : vector<8x1xf32> -> vector<8x1xf32>
    %27 = vector.broadcast %26 : vector<8x1xf32> to vector<8x8xf32>
    %28 = arith.mulf %23, %27 : vector<8x8xf32>
    %29 = arith.truncf %28 : vector<8x8xf32> to vector<8x8xbf16>
    %30 = arith.truncf %15 : vector<8x128xf32> to vector<8x128xbf16>
    %cst_12 = arith.constant dense<0.000000e+00> : vector<8x128xf32>
    %31 = tpu.matmul %29, %30, %cst_12 {dimension_numbers = #tpu.dot_dimension_numbers<[1], [0], [0], [1], [0, 0, 1, 1], [], []>} : vector<8x8xbf16>, vector<8x128xbf16>, vector<8x128xf32> -> vector<8x128xf32>
    %32 = arith.truncf %31 : vector<8x128xf32> to vector<8x128xbf16>
    %c0_13 = arith.constant 0 : index
    %c0_14 = arith.constant 0 : index
    %33 = vector.load %arg5[%c0_13, %c0_14] : memref<128x128xbf16, #tpu.memory_space<vmem>>, vector<128x128xbf16>
    %cst_15 = arith.constant dense<0.000000e+00> : vector<8x128xf32>
    %34 = tpu.matmul %32, %33, %cst_15 {dimension_numbers = #tpu.dot_dimension_numbers<[1], [0], [0], [1], [0, 0, 1, 1], [], []>} : vector<8x128xbf16>, vector<128x128xbf16>, vector<8x128xf32> -> vector<8x128xf32>
    %35 = arith.addf %9, %34 : vector<8x128xf32>
    %36 = arith.truncf %35 : vector<8x128xf32> to vector<8x128xbf16>
    %c0_16 = arith.constant 0 : index
    %c0_17 = arith.constant 0 : index
    %37 = vector.load %arg6[%c0_16, %c0_17] : memref<128x128xbf16, #tpu.memory_space<vmem>>, vector<128x128xbf16>
    %cst_18 = arith.constant dense<0.000000e+00> : vector<8x128xf32>
    %38 = tpu.matmul %36, %37, %cst_18 {dimension_numbers = #tpu.dot_dimension_numbers<[1], [0], [0], [1], [0, 0, 1, 1], [], []>} : vector<8x128xbf16>, vector<128x128xbf16>, vector<8x128xf32> -> vector<8x128xf32>
    %c0_19 = arith.constant 0 : index
    %c0_20 = arith.constant 0 : index
    %39 = vector.load %arg7[%c0_19, %c0_20] : memref<1x128xf32, #tpu.memory_space<vmem>>, vector<1x128xf32>
    %40 = vector.broadcast %39 : vector<1x128xf32> to vector<8x128xf32>
    %41 = arith.addf %38, %40 : vector<8x128xf32>
    %cst_21 = arith.constant 5.000000e-01 : f32
    %42 = vector.broadcast %cst_21 : f32 to vector<8x128xf32>
    %43 = arith.mulf %42, %41 : vector<8x128xf32>
    %cst_22 = arith.constant 4.471500e-02 : f32
    %44 = vector.broadcast %cst_22 : f32 to vector<8x128xf32>
    %45 = arith.mulf %44, %41 : vector<8x128xf32>
    %46 = arith.mulf %45, %41 : vector<8x128xf32>
    %47 = arith.mulf %46, %41 : vector<8x128xf32>
    %48 = arith.addf %41, %47 : vector<8x128xf32>
    %cst_23 = arith.constant 0.797884583 : f32
    %49 = vector.broadcast %cst_23 : f32 to vector<8x128xf32>
    %50 = arith.mulf %49, %48 : vector<8x128xf32>
    %51 = math.tanh %50 : vector<8x128xf32>
    %cst_24 = arith.constant 1.000000e+00 : f32
    %52 = vector.broadcast %cst_24 : f32 to vector<8x128xf32>
    %53 = arith.addf %52, %51 : vector<8x128xf32>
    %54 = arith.mulf %43, %53 : vector<8x128xf32>
    %55 = arith.truncf %54 : vector<8x128xf32> to vector<8x128xbf16>
    %c0_25 = arith.constant 0 : index
    %c0_26 = arith.constant 0 : index
    %56 = vector.load %arg8[%c0_25, %c0_26] : memref<128x128xbf16, #tpu.memory_space<vmem>>, vector<128x128xbf16>
    %cst_27 = arith.constant dense<0.000000e+00> : vector<8x128xf32>
    %57 = tpu.matmul %55, %56, %cst_27 {dimension_numbers = #tpu.dot_dimension_numbers<[1], [0], [0], [1], [0, 0, 1, 1], [], []>} : vector<8x128xbf16>, vector<128x128xbf16>, vector<8x128xf32> -> vector<8x128xf32>
    %58 = arith.addf %35, %57 : vector<8x128xf32>
    %c0_28 = arith.constant 0 : index
    %c0_29 = arith.constant 0 : index
    %59 = vector.load %arg9[%c0_28, %c0_29] : memref<1x128xf32, #tpu.memory_space<vmem>>, vector<1x128xf32>
    %60 = vector.broadcast %59 : vector<1x128xf32> to vector<8x128xf32>
    %61 = arith.addf %58, %60 : vector<8x128xf32>
    %62 = arith.truncf %61 : vector<8x128xf32> to vector<8x128xbf16>
    %c0_30 = arith.constant 0 : index
    %c0_31 = arith.constant 0 : index
    %63 = vector.load %arg10[%c0_30, %c0_31] : memref<128x128xbf16, #tpu.memory_space<vmem>>, vector<128x128xbf16>
    %cst_32 = arith.constant dense<0.000000e+00> : vector<8x128xf32>
    %64 = tpu.matmul %62, %63, %cst_32 {dimension_numbers = #tpu.dot_dimension_numbers<[1], [0], [0], [1], [0, 0, 1, 1], [], []>} : vector<8x128xbf16>, vector<128x128xbf16>, vector<8x128xf32> -> vector<8x128xf32>
    %c0_33 = arith.constant 0 : index
    %c0_34 = arith.constant 0 : index
    %65 = vector.load %arg11[%c0_33, %c0_34] : memref<1x128xf32, #tpu.memory_space<vmem>>, vector<1x128xf32>
    %66 = vector.broadcast %65 : vector<1x128xf32> to vector<8x128xf32>
    %67 = arith.addf %64, %66 : vector<8x128xf32>
    %c0_35 = arith.constant 0 : index
    %c0_36 = arith.constant 0 : index
    %68 = vector.load %arg12[%c0_35, %c0_36] : memref<8x128xf32, #tpu.memory_space<vmem>>, vector<8x128xf32>
    tpu.vector_store %arg12[%c0_35, %c0_36], %67 {strides = array<i32>} : memref<8x128xf32, #tpu.memory_space<vmem>>, vector<8x128xf32>,
    return
  }
  func.func @transform_0(%arg0: i32) -> (i32, i32) {
    %c0_i32 = arith.constant 0 : i32
    %c0_i32_0 = arith.constant 0 : i32
    %c0_i32_1 = arith.constant 0 : i32
    return %c0_i32, %c0_i32_0 : i32, i32
  }
  func.func @transform_1(%arg0: i32) -> (i32, i32) {
    %c0_i32 = arith.constant 0 : i32
    %c0_i32_0 = arith.constant 0 : i32
    %c0_i32_1 = arith.constant 0 : i32
    return %c0_i32, %c0_i32_0 : i32, i32
  }
  func.func @transform_2(%arg0: i32) -> (i32, i32) {
    %c0_i32 = arith.constant 0 : i32
    %c0_i32_0 = arith.constant 0 : i32
    %c0_i32_1 = arith.constant 0 : i32
    return %c0_i32, %c0_i32_0 : i32, i32
  }
  func.func @transform_3(%arg0: i32) -> (i32, i32) {
    %c0_i32 = arith.constant 0 : i32
    %c0_i32_0 = arith.constant 0 : i32
    %c0_i32_1 = arith.constant 0 : i32
    return %c0_i32, %c0_i32_0 : i32, i32
  }
  func.func @transform_4(%arg0: i32) -> (i32, i32) {
    %c0_i32 = arith.constant 0 : i32
    %c0_i32_0 = arith.constant 0 : i32
    %c0_i32_1 = arith.constant 0 : i32
    return %c0_i32, %c0_i32_0 : i32, i32
  }
  func.func @transform_5(%arg0: i32) -> (i32, i32) {
    %c0_i32 = arith.constant 0 : i32
    %c0_i32_0 = arith.constant 0 : i32
    %c0_i32_1 = arith.constant 0 : i32
    return %c0_i32, %c0_i32_0 : i32, i32
  }
  func.func @transform_6(%arg0: i32) -> (i32, i32) {
    %c0_i32 = arith.constant 0 : i32
    %c0_i32_0 = arith.constant 0 : i32
    %c0_i32_1 = arith.constant 0 : i32
    return %c0_i32, %c0_i32_0 : i32, i32
  }
  func.func @transform_7(%arg0: i32) -> (i32, i32) {
    %c0_i32 = arith.constant 0 : i32
    %c0_i32_0 = arith.constant 0 : i32
    %c0_i32_1 = arith.constant 0 : i32
    return %c0_i32, %c0_i32_0 : i32, i32
  }
  func.func @transform_8(%arg0: i32) -> (i32, i32) {
    %c0_i32 = arith.constant 0 : i32
    %c0_i32_0 = arith.constant 0 : i32
    %c0_i32_1 = arith.constant 0 : i32
    return %c0_i32, %c0_i32_0 : i32, i32
  }
  func.func @transform_9(%arg0: i32) -> (i32, i32) {
    %c0_i32 = arith.constant 0 : i32
    %c0_i32_0 = arith.constant 0 : i32
    %c0_i32_1 = arith.constant 0 : i32
    return %c0_i32, %c0_i32_0 : i32, i32
  }
  func.func @transform_10(%arg0: i32) -> (i32, i32) {
    %c0_i32 = arith.constant 0 : i32
    %c0_i32_0 = arith.constant 0 : i32
    %c0_i32_1 = arith.constant 0 : i32
    return %c0_i32, %c0_i32_0 : i32, i32
  }
  func.func @transform_11(%arg0: i32) -> (i32, i32) {
    %c0_i32 = arith.constant 0 : i32
    %c0_i32_0 = arith.constant 0 : i32
    %c0_i32_1 = arith.constant 0 : i32
    return %c0_i32, %c0_i32_0 : i32, i32
  }
}

</mosaic_0001>

<bundles_post_ra>
// kernel: tpu_custom_call.1
= control target key start
LH: loop header
LB: loop body
LE: loop exit
PB: predicated region body
PF: predicated region fallthrough
CT: control target
= control target key end

     0   :  { %16 = vsyncpa [#allocation3], 0  ;;  %s1897_s0 = inlined_call_operand.hbm [shape: f32[8,128], index: 0, kind: input, shape index: {}]   ;;  %s1898_s1 = inlined_call_operand.hbm [shape: bf16[128,128], index: 1, kind: input, shape index: {}]   ;;  %s1899_s2 = inlined_call_operand.vmem [shape: f32[1,128], index: 2, kind: input, shape index: {}]   ;;  %s1900_s3 = inlined_call_operand.hbm [shape: bf16[128,384], index: 3, kind: input, shape index: {}]   ;;  %s1901_s4 = inlined_call_operand.hbm [shape: bf16[128,128], index: 4, kind: input, shape index: {}]   ;;  %s1902_s5 = inlined_call_operand.hbm [shape: bf16[128,128], index: 5, kind: input, shape index: {}]   ;;  %s1903_s6 = inlined_call_operand.vmem [shape: f32[1,128], index: 6, kind: input, shape index: {}]   ;;  %s1904_s7 = inlined_call_operand.hbm [shape: bf16[128,128], index: 7, kind: input, shape index: {}]   ;;  %s1905_s8 = inlined_call_operand.vmem [shape: f32[1,128], index: 8, kind: input, shape index: {}]   ;;  %s1906_s9 = inlined_call_operand.hbm [shape: bf16[128,128], index: 9, kind: input, shape index: {}]   ;;  %s1907_s10 = inlined_call_operand.vmem [shape: f32[1,128], index: 10, kind: input, shape index: {}]   ;;  %s1908_s11 = inlined_call_operand.hbm [shape: f32[8,128], index: 11, kind: output, shape index: {}]  }
   0x1   :  { %17 = vsyncpa [#allocation6], 0 }
   0x2   :  { %18 = vsyncpa [#allocation9], 0 }
   0x3   :  { %19 = vsyncpa [#allocation12], 0 }
   0x4   :  { %20 = vsyncpa [#allocation4], 0  ;;  %s1608_s17 = smov [#allocation5]   ;;  %s1422_s21 = scalar_lea.hbm %s1898_s1, 1024 }
   0x5   :  { %s36_s18 = sshll.u32 %s1608_s17, 4  ;;  %p1423_p0 = scmp.ne.s32.totalorder %s1898_s1, %s1422_s21  ;;  %s37_s18 = int_to_ptr.vmem [resolvable:$true] %s36_s18 }
   0x6   :  { %p1426_p1 = scmp.lt.u32.totalorder %s1422_s21, %s1898_s1 }
   0x8   :  { %p1428_p2 = pnand %p1426_p1, %p1423_p0 }
   0xa   :  { %1431 = shalt.err (!%p1428_p2)
}
   0xb   :  { %s1432_s26 = scalar_lea.vmem %s37_s18, 1024  ;;  %p1437_p4 = scmp.lt.s32.totalorder %s37_s18, %s37_s18 }
   0xc   :  { %p1433_p3 = scmp.ne.s32.totalorder %s37_s18, %s1432_s26  ;;  %p1438_p5 = scmp.lt.s32.totalorder %s1432_s26, %s1432_s26 }
   0xe   :  { %p1439_p6 = por %p1438_p5, %p1437_p4 }
  0x10   :  { %p1440_p7 = pnand %p1439_p6, %p1433_p3 }
  0x12   :  { %1443 = shalt.err (!%p1440_p7)
}
  0x13   :  { %s1609_s27 = smov 64   ;;  %s1610_s28 = smov 4  }
  0x14   :  { %42 = dma.hbm_to_vmem [thread:$0]  %s1898_s1, 1024, %s37_s18, [#allocation6], %s1609_s27, %s1609_s27, %s1610_s28  }
  0x15   :  { %s1611_s12 = smov [#allocation8]   ;;  %s1612_s14 = smov [#allocation11]  }
  0x16   :  { %s62_s13 = sshll.u32 %s1611_s12, 4  ;;  %s88_s15 = sshll.u32 %s1612_s14, 4  ;;  %s63_s13 = int_to_ptr.vmem [resolvable:$true] %s62_s13  ;;  %s89_s15 = int_to_ptr.vmem [resolvable:$true] %s88_s15 }
  0x17   :  { %s1444_s19 = scalar_lea.hbm %s1901_s4, 1024 }
  0x18   :  { %p1445_p8 = scmp.ne.s32.totalorder %s1901_s4, %s1444_s19  ;;  %p1448_p9 = scmp.lt.u32.totalorder %s1444_s19, %s1901_s4 }
  0x1a   :  { %p1450_p10 = pnand %p1448_p9, %p1445_p8 }
  0x1c   :  { %1453 = shalt.err (!%p1450_p10)
}
  0x1d   :  { %s1454_s1 = scalar_lea.vmem %s63_s13, 1024  ;;  %p1459_p12 = scmp.lt.s32.totalorder %s63_s13, %s63_s13 }
  0x1e   :  { %p1455_p11 = scmp.ne.s32.totalorder %s63_s13, %s1454_s1  ;;  %p1460_p13 = scmp.lt.s32.totalorder %s1454_s1, %s1454_s1 }
  0x20   :  { %p1461_p0 = por %p1460_p13, %p1459_p12 }
  0x22   :  { %p1462_p1 = pnand %p1461_p0, %p1455_p11 }
  0x24   :  { %1465 = shalt.err (!%p1462_p1)
}
  0x25   :  { %68 = dma.hbm_to_vmem [thread:$0]  %s1901_s4, 1024, %s63_s13, [#allocation9], %s1609_s27, %s1609_s27, %s1610_s28  }
  0x26   :  { %s1466_s29 = scalar_lea.hbm %s1904_s7, 1024 }
  0x27   :  { %p1467_p2 = scmp.ne.s32.totalorder %s1904_s7, %s1466_s29  ;;  %p1470_p3 = scmp.lt.u32.totalorder %s1466_s29, %s1904_s7 }
  0x29   :  { %p1472_p4 = pnand %p1470_p3, %p1467_p2 }
  0x2b   :  { %1475 = shalt.err (!%p1472_p4)
}
  0x2c   :  { %s1476_s17 = scalar_lea.vmem %s89_s15, 1024  ;;  %p1481_p6 = scmp.lt.s32.totalorder %s89_s15, %s89_s15 }
  0x2d   :  { %p1477_p5 = scmp.ne.s32.totalorder %s89_s15, %s1476_s17  ;;  %p1482_p7 = scmp.lt.s32.totalorder %s1476_s17, %s1476_s17 }
  0x2f   :  { %p1483_p8 = por %p1482_p7, %p1481_p6 }
  0x31   :  { %p1484_p9 = pnand %p1483_p8, %p1477_p5 }
  0x33   :  { %1487 = shalt.err (!%p1484_p9)
}
  0x34   :  { %94 = dma.hbm_to_vmem [thread:$0]  %s1904_s7, 1024, %s89_s15, [#allocation12], %s1609_s27, %s1609_s27, %s1610_s28  }
  0x35   :  { %s1613_s19 = smov [#allocation2]   ;;  %s1614_s21 = smov [#allocation7]  }
  0x36   :  { %s27_s20 = sshll.u32 %s1613_s19, 4  ;;  %s50_s22 = sshll.u32 %s1614_s21, 4  ;;  %s28_s20 = int_to_ptr.vmem [resolvable:$true] %s27_s20  ;;  %s51_s22 = int_to_ptr.vmem [resolvable:$true] %s50_s22 }
  0x37   :  { %s1488_s18 = scalar_lea.hbm %s1897_s0, 128 }
  0x38   :  { %p1489_p10 = scmp.ne.s32.totalorder %s1897_s0, %s1488_s18  ;;  %p1492_p11 = scmp.lt.u32.totalorder %s1488_s18, %s1897_s0 }
  0x3a   :  { %p1494_p12 = pnand %p1492_p11, %p1489_p10 }
  0x3c   :  { %1497 = shalt.err (!%p1494_p12)
}
  0x3d   :  { %s1498_s7 = scalar_lea.vmem %s28_s20, 128  ;;  %p1503_p0 = scmp.lt.s32.totalorder %s28_s20, %s28_s20 }
  0x3e   :  { %p1499_p13 = scmp.ne.s32.totalorder %s28_s20, %s1498_s7  ;;  %p1504_p1 = scmp.lt.s32.totalorder %s1498_s7, %s1498_s7 }
  0x40   :  { %p1505_p2 = por %p1504_p1, %p1503_p0 }
  0x42   :  { %p1506_p3 = pnand %p1505_p2, %p1499_p13 }
  0x44   :  { %1509 = shalt.err (!%p1506_p3)
}
  0x45   :  { %30 = dma.hbm_to_vmem [thread:$0]  %s1897_s0, 128, %s28_s20, [#allocation3]  }
  0x46   :  { %s1510_s16 = scalar_lea.hbm %s1900_s3, 3072 }
  0x47   :  { %p1511_p4 = scmp.ne.s32.totalorder %s1900_s3, %s1510_s16  ;;  %p1514_p5 = scmp.lt.u32.totalorder %s1510_s16, %s1900_s3 }
  0x49   :  { %p1516_p6 = pnand %p1514_p5, %p1511_p4 }
  0x4b   :  { %1519 = shalt.err (!%p1516_p6)
}
  0x4c   :  { %s1520_s21 = scalar_lea.vmem %s51_s22, 3072  ;;  %p1525_p8 = scmp.lt.s32.totalorder %s51_s22, %s51_s22 }
  0x4d   :  { %p1521_p7 = scmp.ne.s32.totalorder %s51_s22, %s1520_s21  ;;  %p1526_p9 = scmp.lt.s32.totalorder %s1520_s21, %s1520_s21 }
  0x4f   :  { %p1527_p10 = por %p1526_p9, %p1525_p8 }
  0x51   :  { %p1528_p11 = pnand %p1527_p10, %p1521_p7 }
  0x53   :  { %1531 = shalt.err (!%p1528_p11)
}
  0x54   :  { %s1615_s0 = smov 192   ;;  %s1616_s20 = smov 12  }
  0x55   :  { %56 = dma.hbm_to_vmem [thread:$0]  %s1900_s3, 3072, %s51_s22, [#allocation6], %s1615_s0, %s1615_s0, %s1616_s20  }
  0x56   :  { %s1617_s18 = smov [#allocation10]   ;;  %s1618_s25 = smov [#allocation13]  }
  0x57   :  { %s74_s24 = sshll.u32 %s1617_s18, 4  ;;  %s102_s26 = sshll.u32 %s1618_s25, 4  ;;  %s75_s24 = int_to_ptr.vmem [resolvable:$true] %s74_s24  ;;  %s103_s26 = int_to_ptr.vmem [resolvable:$true] %s102_s26 }
  0x58   :  { %s1532_s15 = scalar_lea.hbm %s1902_s5, 1024 }
  0x59   :  { %p1533_p12 = scmp.ne.s32.totalorder %s1902_s5, %s1532_s15  ;;  %p1536_p13 = scmp.lt.u32.totalorder %s1532_s15, %s1902_s5 }
  0x5b   :  { %p1538_p0 = pnand %p1536_p13, %p1533_p12 }
  0x5d   :  { %1541 = shalt.err (!%p1538_p0)
}
  0x5e   :  { %s1542_s3 = scalar_lea.vmem %s75_s24, 1024  ;;  %p1547_p2 = scmp.lt.s32.totalorder %s75_s24, %s75_s24 }
  0x5f   :  { %p1543_p1 = scmp.ne.s32.totalorder %s75_s24, %s1542_s3  ;;  %p1548_p3 = scmp.lt.s32.totalorder %s1542_s3, %s1542_s3 }
  0x61   :  { %p1549_p4 = por %p1548_p3, %p1547_p2 }
  0x63   :  { %p1550_p5 = pnand %p1549_p4, %p1543_p1 }
  0x65   :  { %1553 = shalt.err (!%p1550_p5)
}
  0x66   :  { %80 = dma.hbm_to_vmem [thread:$0]  %s1902_s5, 1024, %s75_s24, [#allocation9], %s1609_s27, %s1609_s27, %s1610_s28  }
  0x67   :  { %s1554_s19 = scalar_lea.hbm %s1906_s9, 1024 }
  0x68   :  { %p1555_p6 = scmp.ne.s32.totalorder %s1906_s9, %s1554_s19  ;;  %p1558_p7 = scmp.lt.u32.totalorder %s1554_s19, %s1906_s9 }
  0x6a   :  { %p1560_p8 = pnand %p1558_p7, %p1555_p6 }
  0x6c   :  { %1563 = shalt.err (!%p1560_p8)
}
  0x6d   :  { %s1564_s1 = scalar_lea.vmem %s103_s26, 1024  ;;  %p1569_p10 = scmp.lt.s32.totalorder %s103_s26, %s103_s26 }
  0x6e   :  { %p1565_p9 = scmp.ne.s32.totalorder %s103_s26, %s1564_s1  ;;  %p1570_p11 = scmp.lt.s32.totalorder %s1564_s1, %s1564_s1 }
  0x70   :  { %p1571_p12 = por %p1570_p11, %p1569_p10 }
  0x72   :  { %p1572_p13 = pnand %p1571_p12, %p1565_p9 }
  0x74   :  { %1575 = shalt.err (!%p1572_p13)
}
  0x75   :  { %108 = dma.hbm_to_vmem [thread:$0]  %s1906_s9, 1024, %s103_s26, [#allocation12], %s1609_s27, %s1609_s27, %s1610_s28  }
  0x76   :  { %1598 = dma.done.wait [#allocation3], 128  }
  0x77   :  { %1599 = vsyncadd [#allocation3], 4294967168 }
  0x78   :  { %1600 = dma.done.wait [#allocation6], 4096  }
  0x79   :  { %1601 = vsyncadd [#allocation6], 4294963200 }
  0x7a   :  { %1602 = dma.done.wait [#allocation9], 2048  }
  0x7b   :  { %1603 = vsyncadd [#allocation9], 4294965248 }
  0x7c   :  { %1604 = dma.done.wait [#allocation12], 2048  }
  0x7d   :  { %1605 = vsyncadd [#allocation12], 4294965248  ;;  %v1619_v0 = vmov 0.0   ;;  %vm1620_vm0 = vmmov 0   ;;  %v1344_v1 = vld [vmem:[#allocation5] sm:$0xff]   ;;  %v1345_v2 = vld [vmem:[#allocation5 + $0x8] sm:$0xff]  }
  0x7e   :  { %1197 = vmatprep.subr.bf16.mxu0 %v1619_v0  ;;  %1213 = vmatprep.mubr.msk.bf16.mxu0 %vm1620_vm0, %v1619_v0  ;;  %v1346_v3 = vld [vmem:[#allocation5 + $0x10] sm:$0xff]   ;;  %v1354_v5 = vld [vmem:[#allocation7] ss:$12 sps:$4 sm:$0xff]   ;;  %v1347_v6 = vld [vmem:[#allocation5 + $0x18] sm:$0xff]   ;;  %v1621_v36 = vmov 0   ;;  %vm549_vm4 = vcmask 1043456  }
  0x7f   :  { %1198 = vmatpush3.bf16.msra.mxu0 %v1344_v1  ;;  %v1352_v4 = vld [vmem:[#allocation7 + $0x4] ss:$12 sps:$4 sm:$0xff]   ;;  %v1356_v7 = vld [vmem:[#allocation7 + $0x1c] ss:$12 sps:$4 sm:$0xff]   ;;  %v1360_v10 = vld [vmem:[#allocation7 + $0x34] ss:$12 sps:$4 sm:$0xff]   ;;  %441 = vmatprep.mubr.bf16.mxu1 %v1621_v36 }
  0x80   :  { %1199 = vmatprep.subr.bf16.mxu0 %v1619_v0  ;;  %409 = vmatprep.subr.bf16.mxu1 %v1352_v4  ;;  %v1358_v8 = vld [vmem:[#allocation7 + $0x18] ss:$12 sps:$4 sm:$0xff]   ;;  %v1362_v12 = vld [vmem:[#allocation7 + $0x30] ss:$12 sps:$4 sm:$0xff]   ;;  %v1349_v14 = vld [vmem:[#allocation5 + $0x28] sm:$0xff]   ;;  %vm532_vm5 = vcmask 64512  }
  0x81   :  { %410 = vmatpush1.bf16.msra.mxu1 %v1354_v5  ;;  %v1348_v9 = vld [vmem:[#allocation5 + $0x20] sm:$0xff]   ;;  %v133_v11 = vld [vmem:[#allocation2] sm:$0xff]  ;;  %v1366_v15 = vld [vmem:[#allocation7 + $0x48] ss:$12 sps:$4 sm:$0xff]   ;;  %s1622_s29 = smov [#allocation14]  }
  0x82   :  { %411 = vmatprep.subr.bf16.mxu1 %v1356_v7  ;;  %v1364_v13 = vld [vmem:[#allocation7 + $0x4c] ss:$12 sps:$4 sm:$0xff]   ;;  %vm134_vm1 = vcmp.ne.f32.partialorder %v133_v11, %v133_v11  ;;  %v1350_v16 = vld [vmem:[#allocation5 + $0x30] sm:$0xff]   ;;  %v1372_v21 = vld [vmem:[#allocation7 + $0x7c] ss:$12 sps:$4 sm:$0xff]   ;;  %v1077_v25 = vpack.c.bf16 %v133_v11, %v133_v11  ;;  %s1053_s7 = sshll.u32 %s1622_s29, 4  ;;  %s1054_s7 = int_to_ptr.vmem [resolvable:$true] %s1053_s7 }
  0x83   :  { %1200 = vmatpush3.bf16.msra.mxu0 %v1345_v2  ;;  %v1368_v17 = vld [vmem:[#allocation7 + $0x64] ss:$12 sps:$4 sm:$0xff]   ;;  %vm1790_vm2 = vmneg %vm134_vm1  ;;  %v1351_v19 = vld [vmem:[#allocation5 + $0x38] sm:$0xff]   ;;  %p1581_p1 = scmp.lt.s32.totalorder %s1054_s7, %s1054_s7 }
  0x84   :  { %1201 = vmatprep.subr.bf16.mxu0 %v1619_v0  ;;  %v1370_v20 = vld [vmem:[#allocation7 + $0x60] ss:$12 sps:$4 sm:$0xff]   ;;  %vm1076_vm3 = vmpackc.low %vm1790_vm2, %vm1790_vm2  ;;  %v1374_v22 = vld [vmem:[#allocation7 + $0x78] ss:$12 sps:$4 sm:$0xff]  }
  0x85   :  { %412 = vmatpush1.bf16.msra.mxu1 %v1358_v8  ;;  %v1376_v23 = vld [vmem:[#allocation7 + $0x94] ss:$12 sps:$4 sm:$0xff]   ;;  %v1378_v26 = vld [vmem:[#allocation7 + $0x90] ss:$12 sps:$4 sm:$0xff]   ;;  %v1363_v28 = vld [vmem:[#allocation7 + $0x38] ss:$12 sps:$4 sm:$0xff]  }
  0x86   :  { %413 = vmatprep.subr.bf16.mxu1 %v1360_v10  ;;  %v1355_v24 = vld [vmem:[#allocation7 + $0x8] ss:$12 sps:$4 sm:$0xff]   ;;  %v1359_v27 = vld [vmem:[#allocation7 + $0x20] ss:$12 sps:$4 sm:$0xff]   ;;  %v1367_v29 = vld [vmem:[#allocation7 + $0x50] ss:$12 sps:$4 sm:$0xff]  }
  0x87   :  { %1202 = vmatpush3.bf16.msra.mxu0 %v1346_v3  ;;  %v1371_v30 = vld [vmem:[#allocation7 + $0x68] ss:$12 sps:$4 sm:$0xff]   ;;  %v1375_v31 = vld [vmem:[#allocation7 + $0x80] ss:$12 sps:$4 sm:$0xff]   ;;  %v1379_v32 = vld [vmem:[#allocation7 + $0x98] ss:$12 sps:$4 sm:$0xff]  }
  0x88   :  { %1203 = vmatprep.subr.bf16.mxu0 %v1619_v0  ;;  %v1380_v33 = vld [vmem:[#allocation7 + $0xac] ss:$12 sps:$4 sm:$0xff]   ;;  %v1382_v34 = vld [vmem:[#allocation7 + $0xa8] ss:$12 sps:$4 sm:$0xff]   ;;  %v1383_v35 = vld [vmem:[#allocation7 + $0xb0] ss:$12 sps:$4 sm:$0xff]  }
  0x89   :  { %414 = vmatpush1.bf16.msra.mxu1 %v1362_v12  ;;  %v1065_v37 = vld [vmem:[%s1899_s2] ss:$0 sm:$0xff]  ;;  %v1385_v8 = vld [vmem:[#allocation8 + $0x8] sm:$0xff]   ;;  %v1388_v11 = vld [vmem:[#allocation8 + $0x20] sm:$0xff]  }
  0x8a   :  { %415 = vmatprep.subr.bf16.mxu1 %v1364_v13  ;;  %v1387_v10 = vld [vmem:[#allocation8 + $0x18] sm:$0xff]   ;;  %v1389_v12 = vld [vmem:[#allocation8 + $0x28] sm:$0xff]   ;;  %v1390_v13 = vld [vmem:[#allocation8 + $0x30] sm:$0xff]  }
  0x8b   :  { %1204 = vmatpush3.bf16.msra.mxu0 %v1347_v6  ;;  %v1384_v6 = vld [vmem:[#allocation8] sm:$0xff]   ;;  %v1395_v18 = vld [vmem:[#allocation10 + $0x18] sm:$0xff]   ;;  %v1402_v36 = vld [vmem:[#allocation11 + $0x10] sm:$0xff]  }
  0x8c   :  { %1205 = vmatprep.subr.bf16.mxu0 %v1619_v0 }
  0x8d   :  { %416 = vmatpush1.bf16.msra.mxu1 %v1366_v15  ;;  %v1392_v15 = vld [vmem:[#allocation10] sm:$0xff]  }
  0x8e   :  { %417 = vmatprep.subr.bf16.mxu1 %v1368_v17  ;;  %v1394_v17 = vld [vmem:[#allocation10 + $0x10] sm:$0xff]  }
  0x8f   :  { %1206 = vmatpush3.bf16.msra.mxu0 %v1348_v9  ;;  %v1386_v9 = vld [vmem:[#allocation8 + $0x10] sm:$0xff]  }
  0x90   :  { %1207 = vmatprep.subr.bf16.mxu0 %v1619_v0 }
  0x91   :  { %418 = vmatpush1.bf16.msra.mxu1 %v1370_v20  ;;  %v1397_v20 = vld [vmem:[#allocation10 + $0x28] sm:$0xff]  }
  0x92   :  { %419 = vmatprep.subr.bf16.mxu1 %v1372_v21  ;;  %v1398_v21 = vld [vmem:[#allocation10 + $0x30] sm:$0xff]  }
  0x93   :  { %1208 = vmatpush3.bf16.msra.mxu0 %v1349_v14  ;;  %v1391_v14 = vld [vmem:[#allocation8 + $0x38] sm:$0xff]  }
  0x94   :  { %1209 = vmatprep.subr.bf16.mxu0 %v1619_v0 }
  0x95   :  { %420 = vmatpush1.bf16.msra.mxu1 %v1374_v22 }
  0x96   :  { %421 = vmatprep.subr.bf16.mxu1 %v1376_v23 }
  0x97   :  { %1210 = vmatpush3.bf16.msra.mxu0 %v1350_v16  ;;  %v1393_v16 = vld [vmem:[#allocation10 + $0x8] sm:$0xff]  }
  0x98   :  { %1211 = vmatprep.subr.bf16.mxu0 %v1619_v0 }
  0x99   :  { %422 = vmatpush1.bf16.msra.mxu1 %v1378_v26 }
  0x9a   :  { %423 = vmatprep.subr.bf16.mxu1 %v1380_v33 }
  0x9b   :  { %1212 = vmatpush3.bf16.msra.mxu0 %v1351_v19  ;;  %v1396_v19 = vld [vmem:[#allocation10 + $0x20] sm:$0xff]  }
  0x9c   :  { %1217 = vmatprep.subr.bf16.mxu0 %v1619_v0 }
  0x9d   :  { %424 = vmatpush1.bf16.msra.mxu1 %v1382_v34 }
  0x9e   :  { %1214 = vmatmul.mubr.msk.bf16.vlgmr.msra.gmra.mrb[0].mxu0 %vm1076_vm3, %v1077_v25  ;;  %1237 = vmatprep.subr.bf16.mxu1 %v1619_v0 }
  0x9f   :  { %1218 = vmatpush3.bf16.msra.mxu0 %v1355_v24  ;;  %1233 = vmatprep.mubr.msk.bf16.mxu0 %vm1620_vm0, %v1619_v0 }
  0xa0   :  { %1219 = vmatprep.subr.bf16.mxu0 %v1619_v0 }
  0xa3   :  { %1220 = vmatpush3.bf16.msra.mxu0 %v1359_v27  ;;  %v1399_v27 = vld [vmem:[#allocation10 + $0x38] sm:$0xff]  }
  0xa4   :  { %1221 = vmatprep.subr.bf16.mxu0 %v1619_v0 }
  0xa7   :  { %1222 = vmatpush3.bf16.msra.mxu0 %v1363_v28  ;;  %v1400_v28 = vld [vmem:[#allocation11] sm:$0xff]  }
  0xa8   :  { %1223 = vmatprep.subr.bf16.mxu0 %v1619_v0 }
  0xab   :  { %1224 = vmatpush3.bf16.msra.mxu0 %v1367_v29 }
  0xac   :  { %1225 = vmatprep.subr.bf16.mxu0 %v1619_v0 }
  0xaf   :  { %1226 = vmatpush3.bf16.msra.mxu0 %v1371_v30 }
  0xb0   :  { %1227 = vmatprep.subr.bf16.mxu0 %v1619_v0 }
  0xb3   :  { %1228 = vmatpush3.bf16.msra.mxu0 %v1375_v31 }
  0xb4   :  { %1229 = vmatprep.subr.bf16.mxu0 %v1619_v0 }
  0xb7   :  { %1230 = vmatpush3.bf16.msra.mxu0 %v1379_v32 }
  0xb8   :  { %1231 = vmatprep.subr.bf16.mxu0 %v1619_v0 }
  0xbb   :  { %1232 = vmatpush3.bf16.msra.mxu0 %v1383_v35  ;;  %v1401_v35 = vld [vmem:[#allocation11 + $0x8] sm:$0xff]  }
  0xbc   :  { %1269 = vmatprep.subr.bf16.mxu0 %v1619_v0 }
 0x171   :  { %v242_v38 = vpop.f32.mrb[0].mxu0 }
 0x172   :  { %v1819_v39 = vadd.f32 %v1065_v37, %v242_v38  ;;  %v1215_v40 = vpop.f32.mrb[1].mxu0  ;;  %v1403_v37 = vld [vmem:[#allocation11 + $0x18] sm:$0xff]   ;;  %v1404_v38 = vld [vmem:[#allocation11 + $0x20] sm:$0xff]  }
 0x173   :  { %v245_v41 = vpop.f32.mrb[2].mxu0  ;;  %v1406_v40 = vld [vmem:[#allocation11 + $0x30] sm:$0xff]  }
 0x174   :  { %v248_v42 = vpack.c.bf16 %v1819_v39, %v1819_v39  ;;  %v1216_v43 = vpop.f32.mrb[3].mxu0  ;;  %v1407_v41 = vld [vmem:[#allocation11 + $0x38] sm:$0xff]  }
 0x175   :  { %v1409_v43 = vld [vmem:[#allocation13 + $0x8] sm:$0xff]  }
 0x176   :  { %442 = vmatmul.mubr.bf16.vlgmr.msra.gmra.mrb[0].mxu1 %v248_v42  ;;  %1234 = vmatmul.mubr.bf16.vlgmr.msra.gmra.mrb[4].mxu0 %v248_v42  ;;  %v1408_v42 = vld [vmem:[#allocation13] sm:$0xff]  }
 0x177   :  { %1239 = vmatprep.mubr.msk.bf16.mxu1 %vm1620_vm0, %v1619_v0  ;;  %1285 = vmatprep.mubr.msk.bf16.mxu0 %vm1620_vm0, %v1619_v0 }
 0x178   :  { %1270 = vmatpush3.bf16.msra.mxu0 %v1392_v15 }
 0x179   :  { %1271 = vmatprep.subr.bf16.mxu0 %v1619_v0 }
 0x17c   :  { %1272 = vmatpush3.bf16.msra.mxu0 %v1393_v16 }
 0x17d   :  { %1273 = vmatprep.subr.bf16.mxu0 %v1619_v0 }
 0x180   :  { %1274 = vmatpush3.bf16.msra.mxu0 %v1394_v17 }
 0x181   :  { %1275 = vmatprep.subr.bf16.mxu0 %v1619_v0 }
 0x184   :  { %1276 = vmatpush3.bf16.msra.mxu0 %v1395_v18 }
 0x185   :  { %1277 = vmatprep.subr.bf16.mxu0 %v1619_v0 }
 0x188   :  { %1278 = vmatpush3.bf16.msra.mxu0 %v1396_v19 }
 0x189   :  { %1279 = vmatprep.subr.bf16.mxu0 %v1619_v0 }
 0x18c   :  { %1280 = vmatpush3.bf16.msra.mxu0 %v1397_v20 }
 0x18d   :  { %1281 = vmatprep.subr.bf16.mxu0 %v1619_v0 }
 0x190   :  { %1282 = vmatpush3.bf16.msra.mxu0 %v1398_v21 }
 0x191   :  { %1283 = vmatprep.subr.bf16.mxu0 %v1619_v0 }
 0x194   :  { %1284 = vmatpush3.bf16.msra.mxu0 %v1399_v27 }
 0x195   :  { %1309 = vmatprep.subr.bf16.mxu0 %v1619_v0 }
 0x249   :  { %v443_v44 = vpop.f32.mrb[0].mxu1  ;;  %v484_v45 = vpop.f32.mrb[4].mxu0 }
 0x24a   :  { %v445_v46 = vpop.f32.mrb[1].mxu1  ;;  %v1235_v47 = vpop.f32.mrb[5].mxu0  ;;  %v545_v53 = vpack.c.bf16 %v484_v45, %v484_v45  ;;  %v490_v54 = vpack.c.bf16 %v443_v44, %v443_v44  ;;  %v1410_v44 = vld [vmem:[#allocation13 + $0x10] sm:$0xff]   ;;  %v1411_v45 = vld [vmem:[#allocation13 + $0x18] sm:$0xff]  }
 0x24b   :  { %v491_v48 = vpack.c.bf16 %v445_v46, %v445_v46  ;;  %v447_v49 = vpop.f32.mrb[2].mxu1  ;;  %v487_v50 = vpop.f32.mrb[6].mxu0  ;;  %v1412_v46 = vld [vmem:[#allocation13 + $0x20] sm:$0xff]   ;;  %v1413_v47 = vld [vmem:[#allocation13 + $0x28] sm:$0xff]  }
 0x24c   :  { %v448_v51 = vpop.f32.mrb[3].mxu1  ;;  %v1236_v52 = vpop.f32.mrb[7].mxu0  ;;  %v551_v55 = vsel %vm549_vm4, %v545_v53, 0 }
 0x24d   :  { %1238 = vmatpush3.bf16.xpose.msra.mxu1 %v491_v48  ;;  %v1112_v48 = vld [vmem:[%s1903_s6] ss:$0 sm:$0xff] }
 0x24e   :  { %1243 = vmatprep.subr.bf16.mxu1 %v1619_v0 }
 0x254   :  { %1240 = vmatmul.mubr.bf16.vlgmr.msra.gmra.mrb[4].mxu1 %v490_v54 }
 0x255   :  { %1244 = vmatpush3.bf16.msra.mxu1 %v551_v55  ;;  %1245 = vmatprep.mubr.msk.bf16.mxu1 %vm1620_vm0, %v1619_v0 }
 0x256   :  { %1249 = vmatprep.subr.bf16.mxu1 %v1619_v0 }
 0x327   :  { %v526_v56 = vpop.f32.mrb[4].mxu1 }
 0x328   :  { %v1241_v57 = vpop.f32.mrb[5].mxu1  ;;  %v533_v58 = vsel %vm532_vm5, %v526_v56, -inf }
 0x329   :  { %534 = vmax.xlane.f32.xlu0 %v533_v58  ;;  %v529_v59 = vpop.f32.mrb[6].mxu1 }
 0x32a   :  { %v1242_v60 = vpop.f32.mrb[7].mxu1 }
 0x3b6   :  { %v535_v61 = vpop.xlane.xlu0 %534 }
 0x3b7   :  { %v536_v62 = vsub.f32 %v526_v56, %v535_v61 }
 0x3b9   :  { %v537_v63 = vmul.f32 1.442695, %v536_v62 }
 0x3bb   :  { %1416 = vpow2.f32 %v537_v63 }
 0x3c5   :  { %v1417_v1 = vpop.eup %1416 }
 0x3c6   :  { %v539_v2 = vsel %vm532_vm5, %v1417_v1, 0.0 }
 0x3c7   :  { %540 = vadd.xlane.f32.xlu0 %v539_v2  ;;  %v1415_v2 = vld [vmem:[#allocation13 + $0x38] sm:$0xff]  }
 0x454   :  { %v541_v3 = vpop.xlane.xlu0 %540 }
 0x455   :  { %1418 = vrcp.f32 %v541_v3 }
 0x45f   :  { %v1419_v4 = vpop.eup %1418 }
 0x460   :  { %v543_v5 = vmul.f32 %v1419_v4, %v1417_v1  ;;  %v1414_v1 = vld [vmem:[#allocation13 + $0x30] sm:$0xff]   ;;  %v1129_v4 = vld [vmem:[%s1905_s8] ss:$0 sm:$0xff]  ;;  %s1576_s8 = scalar_lea.vmem %s1054_s7, 128 }
 0x461   :  { %p1577_p0 = scmp.ne.s32.totalorder %s1054_s7, %s1576_s8  ;;  %p1582_p2 = scmp.lt.s32.totalorder %s1576_s8, %s1576_s8 }
 0x462   :  { %v544_v7 = vpack.c.bf16 %v543_v5, %v543_v5 }
 0x463   :  { %p1583_p3 = por %p1582_p2, %p1581_p1 }
 0x464   :  { %1246 = vmatmul.mubr.msk.bf16.vlgmr.msra.gmra.mrb[8].mxu1 %vm532_vm5, %v544_v7 }
 0x465   :  { %1250 = vmatpush3.bf16.msra.mxu1 %v1384_v6  ;;  %1265 = vmatprep.mubr.msk.bf16.mxu1 %vm1620_vm0, %v1619_v0  ;;  %p1584_p4 = pnand %p1583_p3, %p1577_p0 }
 0x466   :  { %1251 = vmatprep.subr.bf16.mxu1 %v1619_v0 }
 0x469   :  { %1252 = vmatpush3.bf16.msra.mxu1 %v1385_v8 }
 0x46a   :  { %1253 = vmatprep.subr.bf16.mxu1 %v1619_v0 }
 0x46d   :  { %1254 = vmatpush3.bf16.msra.mxu1 %v1386_v9 }
 0x46e   :  { %1255 = vmatprep.subr.bf16.mxu1 %v1619_v0 }
 0x471   :  { %1256 = vmatpush3.bf16.msra.mxu1 %v1387_v10 }
 0x472   :  { %1257 = vmatprep.subr.bf16.mxu1 %v1619_v0 }
 0x475   :  { %1258 = vmatpush3.bf16.msra.mxu1 %v1388_v11  ;;  %v1130_v11 = vld [vmem:[%s1907_s10] ss:$0 sm:$0xff] }
 0x476   :  { %1259 = vmatprep.subr.bf16.mxu1 %v1619_v0 }
 0x479   :  { %1260 = vmatpush3.bf16.msra.mxu1 %v1389_v12 }
 0x47a   :  { %1261 = vmatprep.subr.bf16.mxu1 %v1619_v0 }
 0x47d   :  { %1262 = vmatpush3.bf16.msra.mxu1 %v1390_v13 }
 0x47e   :  { %1263 = vmatprep.subr.bf16.mxu1 %v1619_v0 }
 0x481   :  { %1264 = vmatpush3.bf16.msra.mxu1 %v1391_v14 }
 0x482   :  { %1289 = vmatprep.subr.bf16.mxu1 %v1619_v0 }
 0x537   :  { %v587_v22 = vpop.f32.mrb[8].mxu1 }
 0x538   :  { %v593_v23 = vpack.c.bf16 %v587_v22, %v587_v22  ;;  %v1247_v24 = vpop.f32.mrb[9].mxu1 }
 0x539   :  { %v590_v25 = vpop.f32.mrb[10].mxu1 }
 0x53a   :  { %v1248_v26 = vpop.f32.mrb[11].mxu1  ;;  %1266 = vmatmul.mubr.bf16.vlgmr.msra.gmra.mrb[12].mxu1 %v593_v23 }
 0x53b   :  { %1305 = vmatprep.mubr.msk.bf16.mxu1 %vm1620_vm0, %v1619_v0  ;;  %1290 = vmatpush3.bf16.msra.mxu1 %v1400_v28 }
 0x53c   :  { %1291 = vmatprep.subr.bf16.mxu1 %v1619_v0 }
 0x53f   :  { %1292 = vmatpush3.bf16.msra.mxu1 %v1401_v35 }
 0x540   :  { %1293 = vmatprep.subr.bf16.mxu1 %v1619_v0 }
 0x543   :  { %1294 = vmatpush3.bf16.msra.mxu1 %v1402_v36 }
 0x544   :  { %1295 = vmatprep.subr.bf16.mxu1 %v1619_v0 }
 0x547   :  { %1296 = vmatpush3.bf16.msra.mxu1 %v1403_v37 }
 0x548   :  { %1297 = vmatprep.subr.bf16.mxu1 %v1619_v0 }
 0x54b   :  { %1298 = vmatpush3.bf16.msra.mxu1 %v1404_v38 }
 0x54c   :  { %1299 = vmatprep.subr.bf16.mxu1 %v1619_v0 }
 0x60d   :  { %v692_v29 = vpop.f32.mrb[12].mxu1 }
 0x60e   :  { %v1856_v30 = vadd.f32 %v692_v29, %v1819_v39  ;;  %v1267_v31 = vpop.f32.mrb[13].mxu1  ;;  %v1405_v39 = vld [vmem:[#allocation11 + $0x28] sm:$0xff]  }
 0x60f   :  { %v695_v32 = vpop.f32.mrb[14].mxu1  ;;  %1300 = vmatpush3.bf16.msra.mxu1 %v1405_v39 }
 0x610   :  { %v699_v33 = vpack.c.bf16 %v1856_v30, %v1856_v30  ;;  %v1268_v34 = vpop.f32.mrb[15].mxu1  ;;  %1301 = vmatprep.subr.bf16.mxu1 %v1619_v0 }
 0x612   :  { %1286 = vmatmul.mubr.bf16.vlgmr.msra.gmra.mrb[8].mxu0 %v699_v33 }
 0x613   :  { %1325 = vmatprep.mubr.msk.bf16.mxu0 %vm1620_vm0, %v1619_v0  ;;  %1302 = vmatpush3.bf16.msra.mxu1 %v1406_v40 }
 0x614   :  { %1303 = vmatprep.subr.bf16.mxu1 %v1619_v0  ;;  %1310 = vmatpush3.bf16.msra.mxu0 %v1408_v42 }
 0x615   :  { %1311 = vmatprep.subr.bf16.mxu0 %v1619_v0 }
 0x617   :  { %1304 = vmatpush3.bf16.msra.mxu1 %v1407_v41 }
 0x618   :  { %1312 = vmatpush3.bf16.msra.mxu0 %v1409_v43 }
 0x619   :  { %1313 = vmatprep.subr.bf16.mxu0 %v1619_v0 }
 0x61c   :  { %1314 = vmatpush3.bf16.msra.mxu0 %v1410_v44 }
 0x61d   :  { %1315 = vmatprep.subr.bf16.mxu0 %v1619_v0 }
 0x620   :  { %1316 = vmatpush3.bf16.msra.mxu0 %v1411_v45 }
 0x621   :  { %1317 = vmatprep.subr.bf16.mxu0 %v1619_v0 }
 0x624   :  { %1318 = vmatpush3.bf16.msra.mxu0 %v1412_v46 }
 0x625   :  { %1319 = vmatprep.subr.bf16.mxu0 %v1619_v0 }
 0x628   :  { %1320 = vmatpush3.bf16.msra.mxu0 %v1413_v47 }
 0x629   :  { %1321 = vmatprep.subr.bf16.mxu0 %v1619_v0 }
 0x62c   :  { %1322 = vmatpush3.bf16.msra.mxu0 %v1414_v1 }
 0x62d   :  { %1323 = vmatprep.subr.bf16.mxu0 %v1619_v0 }
 0x630   :  { %1324 = vmatpush3.bf16.msra.mxu0 %v1415_v2 }
 0x6e5   :  { %v805_v49 = vpop.f32.mrb[8].mxu0 }
 0x6e6   :  { %v806_v50 = vadd.f32 %v1112_v48, %v805_v49  ;;  %v1287_v51 = vpop.f32.mrb[9].mxu0 }
 0x6e7   :  { %v808_v52 = vpop.f32.mrb[10].mxu0 }
 0x6e8   :  { %v812_v53 = vmul.f32 0.044715, %v806_v50  ;;  %v1288_v54 = vpop.f32.mrb[11].mxu0  ;;  %v811_v60 = vmul.f32 0.5, %v806_v50 }
 0x6ea   :  { %v813_v55 = vmul.f32 %v812_v53, %v806_v50 }
 0x6ec   :  { %v814_v56 = vmul.f32 %v813_v55, %v806_v50 }
 0x6ee   :  { %v815_v57 = vadd.f32 %v814_v56, %v806_v50 }
 0x6f0   :  { %v816_v58 = vmul.f32 0.7978846, %v815_v57 }
 0x6f2   :  { %1420 = vtanh.f32 %v816_v58 }
 0x6fc   :  { %v1421_v59 = vpop.eup %1420 }
 0x6fd   :  { %v818_v61 = vadd.f32 1.0, %v1421_v59 }
 0x6ff   :  { %v819_v62 = vmul.f32 %v818_v61, %v811_v60 }
 0x701   :  { %v820_v63 = vpack.c.bf16 %v819_v62, %v819_v62 }
 0x703   :  { %1306 = vmatmul.mubr.bf16.vlgmr.msra.gmra.mrb[16].mxu1 %v820_v63 }
 0x7d6   :  { %v919_v3 = vpop.f32.mrb[16].mxu1 }
 0x7d7   :  { %v925_v5 = vadd.f32 %v919_v3, %v1856_v30  ;;  %v1307_v6 = vpop.f32.mrb[17].mxu1 }
 0x7d8   :  { %v922_v7 = vpop.f32.mrb[18].mxu1 }
 0x7d9   :  { %v933_v8 = vadd.f32 %v1129_v4, %v925_v5  ;;  %v1308_v9 = vpop.f32.mrb[19].mxu1 }
 0x7db   :  { %v934_v10 = vpack.c.bf16 %v933_v8, %v933_v8 }
 0x7dd   :  { %1326 = vmatmul.mubr.bf16.vlgmr.msra.gmra.mrb[12].mxu0 %v934_v10 }
 0x8b0   :  { %v1040_v0 = vpop.f32.mrb[12].mxu0 }
 0x8b1   :  { %v1041_v12 = vadd.f32 %v1130_v11, %v1040_v0  ;;  %v1327_v13 = vpop.f32.mrb[13].mxu0 }
 0x8b2   :  { %v1043_v14 = vpop.f32.mrb[14].mxu0 }
 0x8b3   :  { %1046 = vst [vmem:[#allocation14] sm:$0xff] %v1041_v12  ;;  %v1328_v15 = vpop.f32.mrb[15].mxu0 }
 0x8b4   :  { %1587 = shalt.err (!%p1584_p4)
}
 0x8b5   :  { %s1588_s10 = scalar_lea.hbm %s1908_s11, 128 }
 0x8b6   :  { %p1589_p5 = scmp.ne.s32.totalorder %s1908_s11, %s1588_s10  ;;  %p1592_p6 = scmp.lt.u32.totalorder %s1588_s10, %s1908_s11 }
 0x8b8   :  { %p1594_p7 = pnand %p1592_p6, %p1589_p5 }
 0x8ba   :  { %1597 = shalt.err (!%p1594_p7)
}
 0x8bb   :  { %1056 = dma.vmem_to_hbm [thread:$0]  %s1054_s7, 128, %s1908_s11, [#allocation4]  }
 0x8bc   :  { %1606 = dma.done.wait [#allocation4], 128  }
 0x8bd   :  { %1607 = vsyncadd [#allocation4], 4294967168 }
 0x8be   :  { %1060 = vsyncpa [#allocation3], 1 }
 0x8bf   :  { %1061 = vsyncpa [#allocation6], 1 }
 0x8c0   :  { %1062 = vsyncpa [#allocation9], 1 }
 0x8c1   :  { %1063 = vsyncpa [#allocation12], 1 }
 0x8c2   :  { %1064 = vsyncpa [#allocation4], 1 }

</bundles_post_ra>
